<compile_context>
chip_gen: v6e
topology: v6e:2x2x1
jax: 0.10.0
libtpu: 0.0.40
codegen_flags: <defaults>
</compile_context>

<pallas_src>
import functools
import math

import jax
import jax.numpy as jnp
from jax.experimental import pallas as pl
from jax.experimental.pallas import tpu as pltpu

BATCHNORM_EPSILON = 1e-4   # YAMNetParams.BATCHNORM_EPSILON
LANE = 128


def _round_up(x, m):
    return (x + m - 1) // m * m


def _tf_same_pads(size, k, stride):
    """TF-Slim SAME padding (matches Conv2d_tf): returns (out_size, (pad_lo, pad_hi))."""
    out = (size + stride - 1) // stride
    total = max(0, (out - 1) * stride + k - size)
    return out, (total // 2, total - total // 2)


def _sepconv_kernel(ph_ref, wdw_ref, b1_ref, wpw_ref, b2_ref, o_ref,
                    *, kh, kw, stride, hph, out_h, out_w):
    c_in = ph_ref.shape[-1]
    c_out = o_ref.shape[-1]

    # ---- depthwise conv (stride folded into the host-side phase layout) ----
    acc = jnp.zeros((out_h, out_w, c_in), dtype=jnp.float32)
    for i in range(kh):
        p, a = i % stride, i // stride
        for j in range(kw):
            q, bw = j % stride, j // stride
            t = p * stride + q
            # phases[(t)*hph + a + r, bw + c, :] == xpad[r*stride + i, c*stride + j, :]
            tap = ph_ref[t * hph + a: t * hph + a + out_h, bw: bw + out_w, :]
            w_ij = wdw_ref[i * kw + j: i * kw + j + 1, :]      # (1, c_in), BN1 scale folded in
            acc = acc + tap.astype(jnp.float32) * w_ij

    # BN1 bias + ReLU (scale already folded into the depthwise weights).
    h = jnp.maximum(acc + b1_ref[...], 0.0)

    # ---- pointwise 1x1 conv as a lane-dense MXU matmul + BN2 bias + ReLU ----
    hm = h.reshape(out_h * out_w, c_in)
    o = jnp.dot(hm, wpw_ref[...], preferred_element_type=jnp.float32)
    o = jnp.maximum(o + b2_ref[...], 0.0)
    o_ref[...] = o.reshape(out_h, out_w, c_out).astype(o_ref.dtype)


def separable_conv_pallas(x, dw_weight, bn1, pw_weight, bn2, *, stride):
    """SeparableConv forward (inference).

    x:          (B, C_in, H, W)        NCHW (PyTorch layout)
    dw_weight:  (C_in, 1, kh, kw)      depthwise conv weight (groups=C_in, bias=False)
    pw_weight:  (C_out, C_in, 1, 1)    pointwise conv weight (bias=False)
    bn1, bn2:   (gamma, beta, running_mean, running_var)
    returns:    (B, C_out, out_h, out_w)
    """
    B, C_in, H, W = (int(d) for d in x.shape)
    kh, kw = int(dw_weight.shape[2]), int(dw_weight.shape[3])
    C_out = int(pw_weight.shape[0])
    s = int(stride)

    out_h, (pad_t, _pad_b) = _tf_same_pads(H, kh, s)
    out_w, (pad_l, _pad_r) = _tf_same_pads(W, kw, s)

    # Fold eval-mode BatchNorm into per-channel scale/bias.
    g1, be1, m1, v1 = bn1
    g2, be2, m2, v2 = bn2
    scale1 = g1 / jnp.sqrt(v1 + BATCHNORM_EPSILON)
    bias1 = be1 - m1 * scale1
    scale2 = g2 / jnp.sqrt(v2 + BATCHNORM_EPSILON)
    bias2 = be2 - m2 * scale2

    # Lane-dense channel padding (multiples of 128); padded channels compute exact zeros.
    Cp_in = _round_up(C_in, LANE)
    Cp_out = _round_up(C_out, LANE)

    # NCHW -> NHWC, TF-SAME zero pad (+ extra zeros so spatial dims are multiples of stride).
    hph = out_h + (kh - 1) // s
    wph = out_w + (kw - 1) // s
    x_nhwc = jnp.transpose(x, (0, 2, 3, 1)).astype(jnp.float32)
    xpad = jnp.pad(
        x_nhwc,
        ((0, 0),
         (pad_t, s * hph - H - pad_t),
         (pad_l, s * wph - W - pad_l),
         (0, Cp_in - C_in)))

    # Phase (space-to-depth) decomposition: phases[b, (p*s+q)*hph + a, c, :] = xpad[b, a*s+p, c*s+q, :]
    phases = xpad.reshape(B, hph, s, wph, s, Cp_in)
    phases = jnp.transpose(phases, (0, 2, 4, 1, 3, 5)).reshape(B, s * s * hph, wph, Cp_in)

    # Depthwise weight -> (kh*kw, Cp_in) with BN1 scale folded in.
    wdw = jnp.transpose(dw_weight[:, 0, :, :], (1, 2, 0)).reshape(kh * kw, C_in)
    wdw = (wdw * scale1[None, :]).astype(jnp.float32)
    wdw = jnp.pad(wdw, ((0, 0), (0, Cp_in - C_in)))
    b1 = jnp.pad(bias1, (0, Cp_in - C_in)).reshape(1, Cp_in).astype(jnp.float32)

    # Pointwise weight -> (Cp_in, Cp_out) with BN2 scale folded in.
    wpw = (pw_weight[:, :, 0, 0] * scale2[:, None]).T.astype(jnp.float32)   # (C_in, C_out)
    wpw = jnp.pad(wpw, ((0, Cp_in - C_in), (0, Cp_out - C_out)))
    b2 = jnp.pad(bias2, (0, Cp_out - C_out)).reshape(1, Cp_out).astype(jnp.float32)

    kernel = functools.partial(_sepconv_kernel, kh=kh, kw=kw, stride=s,
                               hph=hph, out_h=out_h, out_w=out_w)

    out = pl.pallas_call(
        kernel,
        out_shape=jax.ShapeDtypeStruct((B, out_h, out_w, Cp_out), jnp.float32),
        grid=(B,),
        in_specs=[
            # per-batch activation tile: pipelined (double-buffered) across the parallel grid
            pl.BlockSpec((None, s * s * hph, wph, Cp_in), lambda b: (b, 0, 0, 0)),
            # weights / folded BN params: same block every step -> resident in VMEM
            pl.BlockSpec((kh * kw, Cp_in), lambda b: (0, 0)),
            pl.BlockSpec((1, Cp_in), lambda b: (0, 0)),
            pl.BlockSpec((Cp_in, Cp_out), lambda b: (0, 0)),
            pl.BlockSpec((1, Cp_out), lambda b: (0, 0)),
        ],
        out_specs=pl.BlockSpec((None, out_h, out_w, Cp_out), lambda b: (b, 0, 0, 0)),
        compiler_params=pltpu.CompilerParams(
            dimension_semantics=("parallel",)),
    )(phases, wdw, b1, wpw, b2)

    # Drop channel padding, back to NCHW.
    return jnp.transpose(out[..., :C_out], (0, 3, 1, 2))


def separable_conv_reference(x, dw_weight, bn1, pw_weight, bn2, *, stride):
    """Pure-JAX reference of the PyTorch module (eval mode)."""
    B, C_in, H, W = x.shape
    kh, kw = dw_weight.shape[2], dw_weight.shape[3]
    _, pad_h = _tf_same_pads(H, kh, stride)
    _, pad_w = _tf_same_pads(W, kw, stride)

    def bn_relu(z, params):
        g, b, m, v = params
        zn = (z - m[None, :, None, None]) / jnp.sqrt(v[None, :, None, None] + BATCHNORM_EPSILON)
        return jnp.maximum(zn * g[None, :, None, None] + b[None, :, None, None], 0.0)

    y = jax.lax.conv_general_dilated(
        x, dw_weight, window_strides=(stride, stride), padding=[pad_h, pad_w],
        feature_group_count=C_in, dimension_numbers=("NCHW", "OIHW", "NCHW"),
        precision=jax.lax.Precision.HIGHEST)
    y = bn_relu(y, bn1)
    z = jax.lax.conv_general_dilated(
        y, pw_weight, window_strides=(1, 1), padding=[(0, 0), (0, 0)],
        dimension_numbers=("NCHW", "OIHW", "NCHW"),
        precision=jax.lax.Precision.HIGHEST)
    return bn_relu(z, bn2)


if __name__ == "__main__":
    # Small shapes consistent with the module: batch=2, C_in=32, C_out=64, 16x16 spatial,
    # kernel=3, stride=2 (a typical YAMNet SeparableConv configuration).
    B, C_in, C_out = 2, 32, 64
    H = W = 16
    kernel_size, stride = 3, 2

    key = jax.random.PRNGKey(0)
    keys = jax.random.split(key, 11)

    x = jax.random.normal(keys[0], (B, C_in, H, W), dtype=jnp.float32)

    # PyTorch-style conv inits (bound = 1/sqrt(fan_in)), bias=False in the module.
    bound_dw = 1.0 / math.sqrt(1 * kernel_size * kernel_size)
    dw_weight = jax.random.uniform(keys[1], (C_in, 1, kernel_size, kernel_size),
                                   minval=-bound_dw, maxval=bound_dw, dtype=jnp.float32)
    bound_pw = 1.0 / math.sqrt(C_in)
    pw_weight = jax.random.uniform(keys[2], (C_out, C_in, 1, 1),
                                   minval=-bound_pw, maxval=bound_pw, dtype=jnp.float32)

    def make_bn(kg, kb, km, kv, c):
        gamma = jax.random.uniform(kg, (c,), minval=0.5, maxval=1.5, dtype=jnp.float32)
        beta = 0.1 * jax.random.normal(kb, (c,), dtype=jnp.float32)
        mean = 0.1 * jax.random.normal(km, (c,), dtype=jnp.float32)
        var = jax.random.uniform(kv, (c,), minval=0.5, maxval=1.5, dtype=jnp.float32)
        return gamma, beta, mean, var

    bn1 = make_bn(keys[3], keys[4], keys[5], keys[6], C_in)
    bn2 = make_bn(keys[7], keys[8], keys[9], keys[10], C_out)

    out = separable_conv_pallas(x, dw_weight, bn1, pw_weight, bn2, stride=stride)
    out = jax.block_until_ready(out)

    ref = separable_conv_reference(x, dw_weight, bn1, pw_weight, bn2, stride=stride)
    assert out.shape == (B, C_out, 8, 8), out.shape
    assert jnp.allclose(out, ref, atol=5e-4, rtol=5e-4), float(jnp.max(jnp.abs(out - ref)))

    print("KERNEL_OK")
</pallas_src>

<mosaic_0001>
module attributes {stable_mosaic.version = 11 : i64} {
  func.func @_sepconv_kernel(%arg0: i32, %arg1: memref<1x36x9x128xf32, #tpu.memory_space<vmem>>, %arg2: memref<9x128xf32, #tpu.memory_space<vmem>>, %arg3: memref<1x128xf32, #tpu.memory_space<vmem>>, %arg4: memref<128x128xf32, #tpu.memory_space<vmem>>, %arg5: memref<1x128xf32, #tpu.memory_space<vmem>>, %arg6: memref<1x8x8x128xf32, #tpu.memory_space<vmem>>) attributes {dimension_semantics = [#tpu.dimension_semantics<parallel>], iteration_bounds = array<i64: 2>, scalar_prefetch = 0 : i64, scratch_operands = 0 : i64, tpu.core_type = #tpu.core_type<tc>, window_params = [{transform_indices = @transform_0, window_bounds = array<i64: 1, 36, 9, 128>}, {pipeline_mode = #tpu.pipeline_mode<synchronous>, transform_indices = @transform_1, window_bounds = array<i64: 9, 128>}, {pipeline_mode = #tpu.pipeline_mode<synchronous>, transform_indices = @transform_2, window_bounds = array<i64: 1, 128>}, {pipeline_mode = #tpu.pipeline_mode<synchronous>, transform_indices = @transform_3, window_bounds = array<i64: 128, 128>}, {pipeline_mode = #tpu.pipeline_mode<synchronous>, transform_indices = @transform_4, window_bounds = array<i64: 1, 128>}, {transform_indices = @transform_5, window_bounds = array<i64: 1, 8, 8, 128>}]} {
    %cst = arith.constant 0.000000e+00 : f32
    %0 = vector.broadcast %cst : f32 to vector<8x8x128xf32>
    %c0 = arith.constant 0 : index
    %c0_0 = arith.constant 0 : index
    %c0_1 = arith.constant 0 : index
    %c0_2 = arith.constant 0 : index
    %1 = vector.load %arg1[%c0, %c0_0, %c0_1, %c0_2] : memref<1x36x9x128xf32, #tpu.memory_space<vmem>>, vector<1x8x8x128xf32>
    %2 = vector.shape_cast %1 : vector<1x8x8x128xf32> to vector<8x8x128xf32>
    %c0_3 = arith.constant 0 : index
    %c0_4 = arith.constant 0 : index
    %3 = vector.load %arg2[%c0_3, %c0_4] : memref<9x128xf32, #tpu.memory_space<vmem>>, vector<1x128xf32>
    %4 = vector.shape_cast %3 : vector<1x128xf32> to vector<1x1x128xf32>
    %5 = vector.broadcast %4 : vector<1x1x128xf32> to vector<8x8x128xf32>
    %6 = arith.mulf %2, %5 : vector<8x8x128xf32>
    %7 = arith.addf %0, %6 : vector<8x8x128xf32>
    %c0_5 = arith.constant 0 : index
    %c9 = arith.constant 9 : index
    %c0_6 = arith.constant 0 : index
    %c0_7 = arith.constant 0 : index
    %8 = vector.load %arg1[%c0_5, %c9, %c0_6, %c0_7] : memref<1x36x9x128xf32, #tpu.memory_space<vmem>>, vector<1x8x8x128xf32>
    %9 = vector.shape_cast %8 : vector<1x8x8x128xf32> to vector<8x8x128xf32>
    %c1 = arith.constant 1 : index
    %c0_8 = arith.constant 0 : index
    %10 = vector.load %arg2[%c1, %c0_8] : memref<9x128xf32, #tpu.memory_space<vmem>>, vector<1x128xf32>
    %11 = vector.shape_cast %10 : vector<1x128xf32> to vector<1x1x128xf32>
    %12 = vector.broadcast %11 : vector<1x1x128xf32> to vector<8x8x128xf32>
    %13 = arith.mulf %9, %12 : vector<8x8x128xf32>
    %14 = arith.addf %7, %13 : vector<8x8x128xf32>
    %c0_9 = arith.constant 0 : index
    %c0_10 = arith.constant 0 : index
    %c1_11 = arith.constant 1 : index
    %c0_12 = arith.constant 0 : index
    %15 = vector.load %arg1[%c0_9, %c0_10, %c1_11, %c0_12] : memref<1x36x9x128xf32, #tpu.memory_space<vmem>>, vector<1x8x8x128xf32>
    %16 = vector.shape_cast %15 : vector<1x8x8x128xf32> to vector<8x8x128xf32>
    %c2 = arith.constant 2 : index
    %c0_13 = arith.constant 0 : index
    %17 = vector.load %arg2[%c2, %c0_13] : memref<9x128xf32, #tpu.memory_space<vmem>>, vector<1x128xf32>
    %18 = vector.shape_cast %17 : vector<1x128xf32> to vector<1x1x128xf32>
    %19 = vector.broadcast %18 : vector<1x1x128xf32> to vector<8x8x128xf32>
    %20 = arith.mulf %16, %19 : vector<8x8x128xf32>
    %21 = arith.addf %14, %20 : vector<8x8x128xf32>
    %c0_14 = arith.constant 0 : index
    %c18 = arith.constant 18 : index
    %c0_15 = arith.constant 0 : index
    %c0_16 = arith.constant 0 : index
    %22 = vector.load %arg1[%c0_14, %c18, %c0_15, %c0_16] : memref<1x36x9x128xf32, #tpu.memory_space<vmem>>, vector<1x8x8x128xf32>
    %23 = vector.shape_cast %22 : vector<1x8x8x128xf32> to vector<8x8x128xf32>
    %c3 = arith.constant 3 : index
    %c0_17 = arith.constant 0 : index
    %24 = vector.load %arg2[%c3, %c0_17] : memref<9x128xf32, #tpu.memory_space<vmem>>, vector<1x128xf32>
    %25 = vector.shape_cast %24 : vector<1x128xf32> to vector<1x1x128xf32>
    %26 = vector.broadcast %25 : vector<1x1x128xf32> to vector<8x8x128xf32>
    %27 = arith.mulf %23, %26 : vector<8x8x128xf32>
    %28 = arith.addf %21, %27 : vector<8x8x128xf32>
    %c0_18 = arith.constant 0 : index
    %c27 = arith.constant 27 : index
    %c0_19 = arith.constant 0 : index
    %c0_20 = arith.constant 0 : index
    %29 = vector.load %arg1[%c0_18, %c27, %c0_19, %c0_20] : memref<1x36x9x128xf32, #tpu.memory_space<vmem>>, vector<1x8x8x128xf32>
    %30 = vector.shape_cast %29 : vector<1x8x8x128xf32> to vector<8x8x128xf32>
    %c4 = arith.constant 4 : index
    %c0_21 = arith.constant 0 : index
    %31 = vector.load %arg2[%c4, %c0_21] : memref<9x128xf32, #tpu.memory_space<vmem>>, vector<1x128xf32>
    %32 = vector.shape_cast %31 : vector<1x128xf32> to vector<1x1x128xf32>
    %33 = vector.broadcast %32 : vector<1x1x128xf32> to vector<8x8x128xf32>
    %34 = arith.mulf %30, %33 : vector<8x8x128xf32>
    %35 = arith.addf %28, %34 : vector<8x8x128xf32>
    %c0_22 = arith.constant 0 : index
    %c18_23 = arith.constant 18 : index
    %c1_24 = arith.constant 1 : index
    %c0_25 = arith.constant 0 : index
    %36 = vector.load %arg1[%c0_22, %c18_23, %c1_24, %c0_25] : memref<1x36x9x128xf32, #tpu.memory_space<vmem>>, vector<1x8x8x128xf32>
    %37 = vector.shape_cast %36 : vector<1x8x8x128xf32> to vector<8x8x128xf32>
    %c5 = arith.constant 5 : index
    %c0_26 = arith.constant 0 : index
    %38 = vector.load %arg2[%c5, %c0_26] : memref<9x128xf32, #tpu.memory_space<vmem>>, vector<1x128xf32>
    %39 = vector.shape_cast %38 : vector<1x128xf32> to vector<1x1x128xf32>
    %40 = vector.broadcast %39 : vector<1x1x128xf32> to vector<8x8x128xf32>
    %41 = arith.mulf %37, %40 : vector<8x8x128xf32>
    %42 = arith.addf %35, %41 : vector<8x8x128xf32>
    %c0_27 = arith.constant 0 : index
    %c1_28 = arith.constant 1 : index
    %c0_29 = arith.constant 0 : index
    %c0_30 = arith.constant 0 : index
    %43 = vector.load %arg1[%c0_27, %c1_28, %c0_29, %c0_30] : memref<1x36x9x128xf32, #tpu.memory_space<vmem>>, vector<1x8x8x128xf32>
    %44 = vector.shape_cast %43 : vector<1x8x8x128xf32> to vector<8x8x128xf32>
    %c6 = arith.constant 6 : index
    %c0_31 = arith.constant 0 : index
    %45 = vector.load %arg2[%c6, %c0_31] : memref<9x128xf32, #tpu.memory_space<vmem>>, vector<1x128xf32>
    %46 = vector.shape_cast %45 : vector<1x128xf32> to vector<1x1x128xf32>
    %47 = vector.broadcast %46 : vector<1x1x128xf32> to vector<8x8x128xf32>
    %48 = arith.mulf %44, %47 : vector<8x8x128xf32>
    %49 = arith.addf %42, %48 : vector<8x8x128xf32>
    %c0_32 = arith.constant 0 : index
    %c10 = arith.constant 10 : index
    %c0_33 = arith.constant 0 : index
    %c0_34 = arith.constant 0 : index
    %50 = vector.load %arg1[%c0_32, %c10, %c0_33, %c0_34] : memref<1x36x9x128xf32, #tpu.memory_space<vmem>>, vector<1x8x8x128xf32>
    %51 = vector.shape_cast %50 : vector<1x8x8x128xf32> to vector<8x8x128xf32>
    %c7 = arith.constant 7 : index
    %c0_35 = arith.constant 0 : index
    %52 = vector.load %arg2[%c7, %c0_35] : memref<9x128xf32, #tpu.memory_space<vmem>>, vector<1x128xf32>
    %53 = vector.shape_cast %52 : vector<1x128xf32> to vector<1x1x128xf32>
    %54 = vector.broadcast %53 : vector<1x1x128xf32> to vector<8x8x128xf32>
    %55 = arith.mulf %51, %54 : vector<8x8x128xf32>
    %56 = arith.addf %49, %55 : vector<8x8x128xf32>
    %c0_36 = arith.constant 0 : index
    %c1_37 = arith.constant 1 : index
    %c1_38 = arith.constant 1 : index
    %c0_39 = arith.constant 0 : index
    %57 = vector.load %arg1[%c0_36, %c1_37, %c1_38, %c0_39] : memref<1x36x9x128xf32, #tpu.memory_space<vmem>>, vector<1x8x8x128xf32>
    %58 = vector.shape_cast %57 : vector<1x8x8x128xf32> to vector<8x8x128xf32>
    %c8 = arith.constant 8 : index
    %c0_40 = arith.constant 0 : index
    %59 = vector.load %arg2[%c8, %c0_40] : memref<9x128xf32, #tpu.memory_space<vmem>>, vector<1x128xf32>
    %60 = vector.shape_cast %59 : vector<1x128xf32> to vector<1x1x128xf32>
    %61 = vector.broadcast %60 : vector<1x1x128xf32> to vector<8x8x128xf32>
    %62 = arith.mulf %58, %61 : vector<8x8x128xf32>
    %63 = arith.addf %56, %62 : vector<8x8x128xf32>
    %c0_41 = arith.constant 0 : index
    %c0_42 = arith.constant 0 : index
    %64 = vector.load %arg3[%c0_41, %c0_42] : memref<1x128xf32, #tpu.memory_space<vmem>>, vector<1x128xf32>
    %65 = vector.shape_cast %64 : vector<1x128xf32> to vector<1x1x128xf32>
    %66 = vector.broadcast %65 : vector<1x1x128xf32> to vector<8x8x128xf32>
    %67 = arith.addf %63, %66 : vector<8x8x128xf32>
    %cst_43 = arith.constant 0.000000e+00 : f32
    %68 = vector.broadcast %cst_43 : f32 to vector<8x8x128xf32>
    %69 = arith.maximumf %67, %68 : vector<8x8x128xf32>
    %70 = vector.shape_cast %69 : vector<8x8x128xf32> to vector<64x128xf32>
    %c0_44 = arith.constant 0 : index
    %c0_45 = arith.constant 0 : index
    %71 = vector.load %arg4[%c0_44, %c0_45] : memref<128x128xf32, #tpu.memory_space<vmem>>, vector<128x128xf32>
    %cst_46 = arith.constant dense<0.000000e+00> : vector<64x128xf32>
    %72 = tpu.matmul %70, %71, %cst_46 {dimension_numbers = #tpu.dot_dimension_numbers<[1], [0], [0], [1], [0, 0, 1, 1], [], []>} : vector<64x128xf32>, vector<128x128xf32>, vector<64x128xf32> -> vector<64x128xf32>
    %c0_47 = arith.constant 0 : index
    %c0_48 = arith.constant 0 : index
    %73 = vector.load %arg5[%c0_47, %c0_48] : memref<1x128xf32, #tpu.memory_space<vmem>>, vector<1x128xf32>
    %74 = vector.broadcast %73 : vector<1x128xf32> to vector<64x128xf32>
    %75 = arith.addf %72, %74 : vector<64x128xf32>
    %cst_49 = arith.constant 0.000000e+00 : f32
    %76 = vector.broadcast %cst_49 : f32 to vector<64x128xf32>
    %77 = arith.maximumf %75, %76 : vector<64x128xf32>
    %78 = vector.shape_cast %77 : vector<64x128xf32> to vector<8x8x128xf32>
    %c0_50 = arith.constant 0 : index
    %c0_51 = arith.constant 0 : index
    %c0_52 = arith.constant 0 : index
    %c0_53 = arith.constant 0 : index
    %79 = vector.load %arg6[%c0_50, %c0_51, %c0_52, %c0_53] : memref<1x8x8x128xf32, #tpu.memory_space<vmem>>, vector<1x8x8x128xf32>
    %80 = vector.shape_cast %79 : vector<1x8x8x128xf32> to vector<8x8x128xf32>
    %81 = vector.shape_cast %78 : vector<8x8x128xf32> to vector<1x8x8x128xf32>
    tpu.vector_store %arg6[%c0_50, %c0_51, %c0_52, %c0_53], %81 {strides = array<i32>} : memref<1x8x8x128xf32, #tpu.memory_space<vmem>>, vector<1x8x8x128xf32>,
    return
  }
  func.func @transform_0(%arg0: i32) -> (i32, i32, i32, i32) {
    %c0_i32 = arith.constant 0 : i32
    %c0_i32_0 = arith.constant 0 : i32
    %c0_i32_1 = arith.constant 0 : i32
    %c0_i32_2 = arith.constant 0 : i32
    return %arg0, %c0_i32, %c0_i32_0, %c0_i32_1 : i32, i32, i32, i32
  }
  func.func @transform_1(%arg0: i32) -> (i32, i32) {
    %c0_i32 = arith.constant 0 : i32
    %c0_i32_0 = arith.constant 0 : i32
    %c0_i32_1 = arith.constant 0 : i32
    return %c0_i32, %c0_i32_0 : i32, i32
  }
  func.func @transform_2(%arg0: i32) -> (i32, i32) {
    %c0_i32 = arith.constant 0 : i32
    %c0_i32_0 = arith.constant 0 : i32
    %c0_i32_1 = arith.constant 0 : i32
    return %c0_i32, %c0_i32_0 : i32, i32
  }
  func.func @transform_3(%arg0: i32) -> (i32, i32) {
    %c0_i32 = arith.constant 0 : i32
    %c0_i32_0 = arith.constant 0 : i32
    %c0_i32_1 = arith.constant 0 : i32
    return %c0_i32, %c0_i32_0 : i32, i32
  }
  func.func @transform_4(%arg0: i32) -> (i32, i32) {
    %c0_i32 = arith.constant 0 : i32
    %c0_i32_0 = arith.constant 0 : i32
    %c0_i32_1 = arith.constant 0 : i32
    return %c0_i32, %c0_i32_0 : i32, i32
  }
  func.func @transform_5(%arg0: i32) -> (i32, i32, i32, i32) {
    %c0_i32 = arith.constant 0 : i32
    %c0_i32_0 = arith.constant 0 : i32
    %c0_i32_1 = arith.constant 0 : i32
    %c0_i32_2 = arith.constant 0 : i32
    return %arg0, %c0_i32, %c0_i32_0, %c0_i32_1 : i32, i32, i32, i32
  }
}

</mosaic_0001>

<bundles_post_ra>
// kernel: tpu_custom_call.1
= control target key start
LH: loop header
LB: loop body
LE: loop exit
PB: predicated region body
PF: predicated region fallthrough
CT: control target
= control target key end

     0   :  { %10 = vsyncpa [#allocation3], 0  ;;  %s1420_s0 = inlined_call_operand.vmem [shape: f32[2,36,9,128], index: 0, kind: input, shape index: {}]   ;;  %s1421_s1 = inlined_call_operand.vmem [shape: f32[9,128], index: 1, kind: input, shape index: {}]   ;;  %s1422_s2 = inlined_call_operand.vmem [shape: f32[1,128], index: 2, kind: input, shape index: {}]   ;;  %s1423_s3 = inlined_call_operand.vmem [shape: f32[128,128], index: 3, kind: input, shape index: {}]   ;;  %s1424_s4 = inlined_call_operand.vmem [shape: f32[1,128], index: 4, kind: input, shape index: {}]   ;;  %s1425_s5 = inlined_call_operand.hbm [shape: f32[2,8,8,128], index: 5, kind: output, shape index: {}]  }
   0x1   :  { %12 = vsyncpa [#allocation3 + $0x1], 0  ;;  %s1048_s18 = smov 0   ;;  %s1050_s19 = smov 0  }
   0x2   :  { %s1052_s20 = smov 0   ;;  %s1054_s21 = smov 0  }
   0x3 LB: > { %s1069_s22 = sadd.s32 4294967295, %s1013_s21   ;;  %s732_s23 = sadd.s32 4294967294, %s1013_s21   ;;  %s1013_s21 = sphi %s1054_s21, %s1431_s21   ;;  %s1009_s20 = sphi %s1052_s20, %s1430_s20   ;;  %s1005_s19 = sphi %s1050_s19, %s1429_s19   ;;  %s1001_s18 = sphi %s1048_s18, %s1428_s18  }
   0x4   : > { %s1073_s24 = sadd.s32 1, %s1013_s21   ;;  %s135_s25 = sadd.s32 1, %s1009_s20 }
   0x5   : > { %s132_s26 = ssub.s32 %s1013_s21, %s1073_s24  ;;  %p145_p0 = scmp.ne.s32.totalorder %s1009_s20, %s1005_s19 }
   0x6   : > { %p133_p1 = scmp.eq.s32.totalorder %s132_s26, 0  ;;  %p146_p2 = scmp.eq.s32.totalorder %s1069_s22, 1 }
   0x7   : > { %p151_p3 = scmp.ne.s32.totalorder %s1005_s19, %s1001_s18  ;;  %p152_p4 = scmp.eq.s32.totalorder %s732_s23, 1 }
   0x8   : > { %s1084_s27 = scalar_select %p133_p1, %s1009_s20, %s135_s25  }
   0x9   : > { %p1086_p5 = por %p146_p2, %p145_p0  ;;  %p1090_p6 = por %p152_p4, %p151_p3 }
   0xa   : > { %p735_p7 = scmp.ge.s32.totalorder %s1013_s21, 1  ;;  %p190_p8 = scmp.lt.s32.totalorder %s1013_s21, 3 }
   0xc   : > { %p191_p9 = pnand %p735_p7, %p190_p8 }
   0xd   : > { %p218_p10 = scmp.lt.s32.totalorder (!%p191_p9), %s1069_s22, 1  ;;  %s810_s26 = sshll.u32 (!%p191_p9), %s1069_s22, 10 }
   0xe   : > { %194 = sbr.rel (%p191_p9) target bundleno = 294 (0x126), region = 40  ;;  %s1372_s8 = scalar_lea.hbm (!%p191_p9), %s1425_s5, %s810_s26 }
  0x13   : > { %v527_v0 = vld [vmem:[%s1423_s3 + $0x78] sm:$0xff]  ;;  %v526_v1 = vld [vmem:[%s1423_s3 + $0x70] sm:$0xff]  ;;  %v525_v2 = vld [vmem:[%s1423_s3 + $0x68] sm:$0xff]  ;;  %s219_s11 = scalar_select %p218_p10, %s1069_s22, 1 }
  0x14   : > { %835 = vmatprep.subr.mxu0 %v527_v0  ;;  %879 = vmatprep.subr.mxu1 %v527_v0  ;;  %v524_v3 = vld [vmem:[%s1423_s3 + $0x60] sm:$0xff]  ;;  %v523_v4 = vld [vmem:[%s1423_s3 + $0x58] sm:$0xff]  ;;  %v522_v7 = vld [vmem:[%s1423_s3 + $0x50] sm:$0xff] }
  0x15   : > { %836 = vmatpush3.msra.mxu0 %v527_v0  ;;  %895 = vmatpush3.msra.mxu1 %v527_v0  ;;  %s911_s14 = smul.u32 576, %s219_s11  ;;  %v1116_v5 = vld [vmem:[%s1421_s1] ss:$0 sm:$0xff]  ;;  %v1121_v6 = vld [vmem:[%s1421_s1 + $0x1] ss:$0 sm:$0xff]  ;;  %v521_v23 = vld [vmem:[%s1423_s3 + $0x48] sm:$0xff] }
  0x16   : > { %837 = vmatprep.subr.mxu0 %v526_v1  ;;  %880 = vmatprep.subr.mxu1 %v526_v1  ;;  %v1134_v8 = vld [vmem:[%s1421_s1 + $0x2] ss:$0 sm:$0xff]  ;;  %v1139_v9 = vld [vmem:[%s1421_s1 + $0x3] ss:$0 sm:$0xff]  ;;  %v1144_v10 = vld [vmem:[%s1421_s1 + $0x4] ss:$0 sm:$0xff] }
  0x17   : > { %838 = vmatpush3.msra.mxu0 %v526_v1  ;;  %896 = vmatpush3.msra.mxu1 %v526_v1  ;;  %s1129_s9 = scalar_lea.vmem %s1420_s0, %s911_s14  ;;  %v1158_v20 = vld [vmem:[%s1421_s1 + $0x5] ss:$0 sm:$0xff]  ;;  %v1164_v22 = vld [vmem:[%s1421_s1 + $0x6] ss:$0 sm:$0xff]  ;;  %v1175_v28 = vld [vmem:[%s1421_s1 + $0x7] ss:$0 sm:$0xff] }
  0x18   : > { %839 = vmatprep.subr.mxu0 %v525_v2  ;;  %881 = vmatprep.subr.mxu1 %v525_v2  ;;  %v223_v11 = vld [vmem:[%s1129_s9] sm:$0xff]  ;;  %v739_v12 = vld [vmem:[%s1129_s9 + $0x90] sm:$0xff]  ;;  %v1187_v32 = vld [vmem:[%s1421_s1 + $0x8] ss:$0 sm:$0xff]  ;;  %s1015_s11 = smov [#allocation2]  }
  0x19   : > { %840 = vmatpush3.msra.mxu0 %v525_v2  ;;  %897 = vmatpush3.msra.mxu1 %v525_v2  ;;  %v282_v13 = vld [vmem:[%s1129_s9 + $0x1] sm:$0xff]  ;;  %v236_v14 = vmul.f32 %v1116_v5, %v223_v11  ;;  %v266_v15 = vmul.f32 %v1121_v6, %v739_v12  ;;  %v758_v18 = vld [vmem:[%s1129_s9 + $0x1b0] sm:$0xff]  ;;  %v519_v47 = vld [vmem:[%s1423_s3 + $0x38] sm:$0xff]  ;;  %s957_s12 = sshll.u32 %s1015_s11, 4  ;;  %s958_s12 = int_to_ptr.vmem [resolvable:$false] %s957_s12 }
  0x1a   : > { %841 = vmatprep.subr.mxu0 %v524_v3  ;;  %882 = vmatprep.subr.mxu1 %v524_v3  ;;  %v295_v16 = vmul.f32 %v1134_v8, %v282_v13  ;;  %v749_v17 = vld [vmem:[%s1129_s9 + $0x120] sm:$0xff]  ;;  %v776_v21 = vld [vmem:[%s1129_s9 + $0x10] sm:$0xff]  ;;  %v355_v26 = vmul.f32 %v1144_v10, %v758_v18  ;;  %s959_s13 = scalar_lea.vmem %s958_s12, 2048 }
  0x1b   : > { %842 = vmatpush3.msra.mxu0 %v524_v3  ;;  %898 = vmatpush3.msra.mxu1 %v524_v3  ;;  %v767_v19 = vld [vmem:[%s1129_s9 + $0x121] sm:$0xff]  ;;  %v274_v24 = vadd.f32 %v266_v15, %v236_v14  ;;  %v325_v25 = vmul.f32 %v1139_v9, %v749_v17  ;;  %v1182_v31 = vmul.f32 %v1164_v22, %v776_v21  ;;  %v1196_v37 = vld [vmem:[%s1129_s9 + $0xd0] sm:$0xff] }
  0x1c   : > { %843 = vmatprep.subr.mxu0 %v523_v4  ;;  %883 = vmatprep.subr.mxu1 %v523_v4  ;;  %v785_v27 = vld [vmem:[%s1129_s9 + $0xa0] sm:$0xff]  ;;  %v384_v30 = vmul.f32 %v1158_v20, %v767_v19  ;;  %v237_v34 = vmul.f32 %v776_v21, %v1116_v5  ;;  %v794_v42 = vld [vmem:[%s1129_s9 + $0x11] sm:$0xff]  ;;  %v270_v43 = vmul.f32 %v1121_v6, %v1196_v37  ;;  %v517_v3 = vld [vmem:[%s1423_s3 + $0x28] sm:$0xff] }
  0x1d   : > { %844 = vmatpush3.msra.mxu0 %v523_v4  ;;  %899 = vmatpush3.msra.mxu1 %v523_v4  ;;  %v520_v29 = vld [vmem:[%s1423_s3 + $0x40] sm:$0xff]  ;;  %v303_v35 = vadd.f32 %v295_v16, %v274_v24  ;;  %v267_v40 = vmul.f32 %v785_v27, %v1121_v6  ;;  %v444_v41 = vmul.f32 %v1175_v28, %v785_v27  ;;  %v762_v45 = vld [vmem:[%s1129_s9 + $0x1f0] sm:$0xff] }
  0x1e   : > { %845 = vmatprep.subr.mxu0 %v522_v7  ;;  %884 = vmatprep.subr.mxu1 %v522_v7  ;;  %v1190_v33 = vld [vmem:[%s1129_s9 + $0x40] sm:$0xff]  ;;  %v1215_v49 = vmul.f32 %v1187_v32, %v794_v42  ;;  %v750_v51 = vld [vmem:[%s1129_s9 + $0x130] sm:$0xff]  ;;  %v359_v53 = vmul.f32 %v1144_v10, %v762_v45  ;;  %v296_v0 = vmul.f32 %v794_v42, %v1134_v8 }
  0x1f   : > { %846 = vmatpush3.msra.mxu0 %v522_v7  ;;  %900 = vmatpush3.msra.mxu1 %v522_v7  ;;  %v240_v36 = vmul.f32 %v1116_v5, %v1190_v33  ;;  %v1199_v38 = vld [vmem:[%s1129_s9 + $0x41] sm:$0xff]  ;;  %v333_v48 = vadd.f32 %v325_v25, %v303_v35  ;;  %v780_v55 = vld [vmem:[%s1129_s9 + $0x50] sm:$0xff]  ;;  %v275_v59 = vadd.f32 %v267_v40, %v237_v34  ;;  %v1258_v34 = vld [vmem:[%s1422_s2] ss:$0 sm:$0xff] }
  0x20   : > { %v753_v39 = vld [vmem:[%s1129_s9 + $0x160] sm:$0xff]  ;;  %847 = vmatprep.subr.mxu0 %v521_v23  ;;  %885 = vmatprep.subr.mxu1 %v521_v23  ;;  %v299_v44 = vmul.f32 %v1134_v8, %v1199_v38  ;;  %v518_v56 = vld [vmem:[%s1423_s3 + $0x30] sm:$0xff]  ;;  %v418_v58 = vmul.f32 %v1164_v22, %v780_v55  ;;  %v326_v1 = vmul.f32 %v1139_v9, %v750_v51  ;;  %v513_v51 = vld [vmem:[%s1423_s3 + $0x8] sm:$0xff] }
  0x21   : > { %v771_v46 = vld [vmem:[%s1129_s9 + $0x161] sm:$0xff]  ;;  %848 = vmatpush3.msra.mxu0 %v521_v23  ;;  %901 = vmatpush3.msra.mxu1 %v521_v23  ;;  %v329_v50 = vmul.f32 %v1139_v9, %v753_v39  ;;  %v278_v52 = vadd.f32 %v270_v43, %v240_v36  ;;  %v363_v57 = vadd.f32 %v355_v26, %v333_v48  ;;  %v798_v63 = vld [vmem:[%s1129_s9 + $0x51] sm:$0xff] }
  0x22   : > { %849 = vmatprep.subr.mxu0 %v520_v29  ;;  %886 = vmatprep.subr.mxu1 %v520_v29  ;;  %v388_v54 = vmul.f32 %v1158_v20, %v771_v46  ;;  %v759_v60 = vld [vmem:[%s1129_s9 + $0x1c0] sm:$0xff]  ;;  %v768_v2 = vld [vmem:[%s1129_s9 + $0x131] sm:$0xff]  ;;  %v1237_v11 = vmul.f32 %v1187_v32, %v798_v63  ;;  %v304_v13 = vadd.f32 %v296_v0, %v275_v59 }
  0x23   : > { %850 = vmatpush3.msra.mxu0 %v520_v29  ;;  %902 = vmatpush3.msra.mxu1 %v520_v29  ;;  %v307_v61 = vadd.f32 %v299_v44, %v278_v52  ;;  %v789_v62 = vld [vmem:[%s1129_s9 + $0xe0] sm:$0xff]  ;;  %v392_v4 = vadd.f32 %v384_v30, %v363_v57  ;;  %v356_v14 = vmul.f32 %v1144_v10, %v759_v60  ;;  %v754_v25 = vld [vmem:[%s1129_s9 + $0x170] sm:$0xff]  ;;  %v515_v26 = vld [vmem:[%s1423_s3 + $0x18] sm:$0xff] }
  0x24   : > { %851 = vmatprep.subr.mxu0 %v519_v47  ;;  %887 = vmatprep.subr.mxu1 %v519_v47  ;;  %v448_v7 = vmul.f32 %v1175_v28, %v789_v62  ;;  %v777_v15 = vld [vmem:[%s1129_s9 + $0x20] sm:$0xff]  ;;  %v385_v18 = vmul.f32 %v1158_v20, %v768_v2  ;;  %v334_v23 = vadd.f32 %v326_v1, %v304_v13  ;;  %v786_v29 = vld [vmem:[%s1129_s9 + $0xb0] sm:$0xff] }
  0x25   : > { %852 = vmatpush3.msra.mxu0 %v519_v47  ;;  %903 = vmatpush3.msra.mxu1 %v519_v47  ;;  %v337_v12 = vadd.f32 %v329_v50, %v307_v61  ;;  %v516_v16 = vld [vmem:[%s1423_s3 + $0x20] sm:$0xff]  ;;  %v422_v17 = vadd.f32 %v1182_v31, %v392_v4  ;;  %v415_v19 = vmul.f32 %v1164_v22, %v777_v15  ;;  %v772_v46 = vld [vmem:[%s1129_s9 + $0x171] sm:$0xff] }
  0x26   : > { %853 = vmatprep.subr.mxu0 %v518_v56  ;;  %888 = vmatprep.subr.mxu1 %v518_v56  ;;  %v241_v24 = vmul.f32 %v780_v55, %v1116_v5  ;;  %v271_v30 = vmul.f32 %v789_v62, %v1121_v6  ;;  %v300_v31 = vmul.f32 %v798_v63, %v1134_v8  ;;  %v763_v40 = vld [vmem:[%s1129_s9 + $0x200] sm:$0xff] }
  0x27   : > { %854 = vmatpush3.msra.mxu0 %v518_v56  ;;  %904 = vmatpush3.msra.mxu1 %v518_v56  ;;  %v367_v21 = vadd.f32 %v359_v53, %v337_v12  ;;  %v452_v27 = vadd.f32 %v444_v41, %v422_v17  ;;  %v364_v36 = vadd.f32 %v356_v14, %v334_v23  ;;  %v514_v41 = vld [vmem:[%s1423_s3 + $0x10] sm:$0xff]  ;;  %v795_v43 = vld [vmem:[%s1129_s9 + $0x21] sm:$0xff] }
  0x28   : > { %855 = vmatprep.subr.mxu0 %v517_v3  ;;  %889 = vmatprep.subr.mxu1 %v517_v3  ;;  %v445_v39 = vmul.f32 %v1175_v28, %v786_v29  ;;  %v279_v44 = vadd.f32 %v271_v30, %v241_v24  ;;  %v330_v45 = vmul.f32 %v1139_v9, %v754_v25  ;;  %v781_v57 = vld [vmem:[%s1129_s9 + $0x60] sm:$0xff]  ;;  %v760_v12 = vld [vmem:[%s1129_s9 + $0x1d0] sm:$0xff] }
  0x29   : > { %856 = vmatpush3.msra.mxu0 %v517_v3  ;;  %905 = vmatpush3.msra.mxu1 %v517_v3  ;;  %v396_v35 = vadd.f32 %v388_v54, %v367_v21  ;;  %v481_v42 = vadd.f32 %v1215_v49, %v452_v27  ;;  %v393_v48 = vadd.f32 %v385_v18, %v364_v36  ;;  %v512_v59 = vld [vmem:[%s1423_s3] sm:$0xff] }
  0x2a   : > { %857 = vmatprep.subr.mxu0 %v516_v16  ;;  %890 = vmatprep.subr.mxu1 %v516_v16  ;;  %v474_v50 = vmul.f32 %v1187_v32, %v795_v43  ;;  %v308_v52 = vadd.f32 %v300_v31, %v279_v44  ;;  %v360_v53 = vmul.f32 %v1144_v10, %v763_v40  ;;  %v755_v31 = vld [vmem:[%s1129_s9 + $0x180] sm:$0xff]  ;;  %v796_v44 = vld [vmem:[%s1129_s9 + $0x31] sm:$0xff] }
  0x2b   : > { %858 = vmatpush3.msra.mxu0 %v516_v16  ;;  %906 = vmatpush3.msra.mxu1 %v516_v16  ;;  %v426_v47 = vadd.f32 %v418_v58, %v396_v35  ;;  %v496_v49 = vadd.f32 %v1258_v34, %v481_v42  ;;  %v423_v55 = vadd.f32 %v415_v19, %v393_v48  ;;  %v751_v58 = vld [vmem:[%s1129_s9 + $0x140] sm:$0xff] }
  0x2c   : > { %859 = vmatprep.subr.mxu0 %v515_v26  ;;  %891 = vmatprep.subr.mxu1 %v515_v26  ;;  %v389_v56 = vmul.f32 %v1158_v20, %v772_v46  ;;  %v338_v60 = vadd.f32 %v330_v45, %v308_v52  ;;  %v419_v61 = vmul.f32 %v1164_v22, %v781_v57  ;;  %v799_v19 = vld [vmem:[%s1129_s9 + $0x61] sm:$0xff]  ;;  %v764_v45 = vld [vmem:[%s1129_s9 + $0x210] sm:$0xff] }
  0x2d   : > { %860 = vmatpush3.msra.mxu0 %v515_v26  ;;  %907 = vmatpush3.msra.mxu1 %v515_v26  ;;  %v456_v54 = vadd.f32 %v448_v7, %v426_v47  ;;  %v238_v62 = vmul.f32 %v777_v15, %v1116_v5  ;;  %v504_v63 = vmax.f32 %v496_v49, 0.0  ;;  %v453_v1 = vadd.f32 %v445_v39, %v423_v55  ;;  %v790_v15 = vld [vmem:[%s1129_s9 + $0xf0] sm:$0xff]  ;;  %v787_v40 = vld [vmem:[%s1129_s9 + $0xc0] sm:$0xff] }
  0x2e   : > { %861 = vmatprep.subr.mxu0 %v514_v41  ;;  %892 = vmatprep.subr.mxu1 %v514_v41  ;;  %v268_v2 = vmul.f32 %v786_v29, %v1121_v6  ;;  %v368_v3 = vadd.f32 %v360_v53, %v338_v60  ;;  %v297_v4 = vmul.f32 %v795_v43, %v1134_v8  ;;  %v778_v39 = vld [vmem:[%s1129_s9 + $0x30] sm:$0xff]  ;;  %v773_v53 = vld [vmem:[%s1129_s9 + $0x181] sm:$0xff] }
  0x2f   : > { %862 = vmatpush3.msra.mxu0 %v514_v41  ;;  %908 = vmatpush3.msra.mxu1 %v514_v41  ;;  %v485_v0 = vadd.f32 %v1237_v11, %v456_v54  ;;  %v327_v7 = vmul.f32 %v1139_v9, %v751_v58  ;;  %v482_v14 = vadd.f32 %v474_v50, %v453_v1  ;;  %v769_v11 = vld [vmem:[%s1129_s9 + $0x141] sm:$0xff]  ;;  %v800_v1 = vld [vmem:[%s1129_s9 + $0x71] sm:$0xff] }
  0x30   : > { %863 = vmatprep.subr.mxu0 %v513_v51  ;;  %893 = vmatprep.subr.mxu1 %v513_v51  ;;  %v276_v16 = vadd.f32 %v268_v2, %v238_v62  ;;  %v397_v17 = vadd.f32 %v389_v56, %v368_v3  ;;  %v449_v18 = vmul.f32 %v1175_v28, %v790_v15 }
  0x31   : > { %864 = vmatpush3.msra.mxu0 %v513_v51  ;;  %909 = vmatpush3.msra.mxu1 %v513_v51  ;;  %v500_v13 = vadd.f32 %v1258_v34, %v485_v0  ;;  %v497_v23 = vadd.f32 %v1258_v34, %v482_v14  ;;  %v357_v25 = vmul.f32 %v1144_v10, %v760_v12  ;;  %v752_v51 = vld [vmem:[%s1129_s9 + $0x150] sm:$0xff]  ;;  %v791_v0 = vld [vmem:[%s1129_s9 + $0x100] sm:$0xff] }
  0x32   : > { %865 = vmatprep.subr.mxu0 %v512_v59  ;;  %894 = vmatprep.subr.mxu1 %v512_v59  ;;  %v305_v24 = vadd.f32 %v297_v4, %v276_v16  ;;  %v427_v26 = vadd.f32 %v419_v61, %v397_v17  ;;  %v478_v27 = vmul.f32 %v1187_v32, %v799_v19  ;;  %v761_v61 = vld [vmem:[%s1129_s9 + $0x1e0] sm:$0xff]  ;;  %v770_v14 = vld [vmem:[%s1129_s9 + $0x151] sm:$0xff] }
  0x33   : > { %866 = vmatpush3.msra.mxu0 %v512_v59  ;;  %910 = vmatpush3.msra.mxu1 %v512_v59  ;;  %v508_v21 = vmax.f32 %v500_v13, 0.0  ;;  %v386_v29 = vmul.f32 %v1158_v20, %v769_v11  ;;  %v242_v30 = vmul.f32 %v781_v57, %v1116_v5  ;;  %v505_v35 = vmax.f32 %v497_v23, 0.0  ;;  %v782_v59 = vld [vmem:[%s1129_s9 + $0x70] sm:$0xff] }
  0x34   : > { %867 = vmatprep.mubr.f32.mxu0 %v504_v63  ;;  %v335_v36 = vadd.f32 %v327_v7, %v305_v24  ;;  %v272_v41 = vmul.f32 %v790_v15, %v1121_v6  ;;  %v301_v42 = vmul.f32 %v799_v19, %v1134_v8  ;;  %v457_v43 = vadd.f32 %v449_v18, %v427_v26  ;;  %v756_v18 = vld [vmem:[%s1129_s9 + $0x190] sm:$0xff] }
  0x35   : > { %873 = vmatprep.mubr.f32.mxu1 %v508_v21  ;;  %868 = vmatmul.mubr.f32.vlgmr.msra.gmra.mxu0 %v505_v35  ;;  %v416_v47 = vmul.f32 %v1164_v22, %v778_v39  ;;  %v331_v50 = vmul.f32 %v1139_v9, %v755_v31  ;;  %v446_v52 = vmul.f32 %v1175_v28, %v787_v40 }
  0x36   : > { %v365_v46 = vadd.f32 %v357_v25, %v335_v36  ;;  %v280_v48 = vadd.f32 %v272_v41, %v242_v30  ;;  %v486_v49 = vadd.f32 %v478_v27, %v457_v43  ;;  %v239_v54 = vmul.f32 %v778_v39, %v1116_v5 }
  0x37   : > { %v269_v55 = vmul.f32 %v787_v40, %v1121_v6  ;;  %v361_v58 = vmul.f32 %v1144_v10, %v764_v45  ;;  %v298_v60 = vmul.f32 %v796_v44, %v1134_v8  ;;  %v475_v63 = vmul.f32 %v1187_v32, %v796_v44 }
  0x38   : > { %v394_v56 = vadd.f32 %v386_v29, %v365_v46  ;;  %v309_v57 = vadd.f32 %v301_v42, %v280_v48  ;;  %v501_v62 = vadd.f32 %v1258_v34, %v486_v49  ;;  %v328_v3 = vmul.f32 %v1139_v9, %v752_v51  ;;  %v765_v29 = vld [vmem:[%s1129_s9 + $0x220] sm:$0xff]  ;;  %v792_v49 = vld [vmem:[%s1129_s9 + $0x110] sm:$0xff] }
  0x39   : > { %v277_v2 = vadd.f32 %v269_v55, %v239_v54  ;;  %v390_v12 = vmul.f32 %v1158_v20, %v773_v53  ;;  %v420_v13 = vmul.f32 %v1164_v22, %v782_v59  ;;  %v358_v11 = vmul.f32 %v1144_v10, %v761_v61  ;;  %v801_v55 = vld [vmem:[%s1129_s9 + $0x81] sm:$0xff] }
  0x3a   : > { %v424_v4 = vadd.f32 %v416_v47, %v394_v56  ;;  %v339_v7 = vadd.f32 %v331_v50, %v309_v57  ;;  %v509_v15 = vmax.f32 %v501_v62, 0.0  ;;  %v243_v17 = vmul.f32 %v782_v59, %v1116_v5 }
  0x3b   : > { %v306_v16 = vadd.f32 %v298_v60, %v277_v2  ;;  %v273_v23 = vmul.f32 %v791_v0, %v1121_v6  ;;  %v302_v24 = vmul.f32 %v800_v1, %v1134_v8  ;;  %v450_v25 = vmul.f32 %v1175_v28, %v791_v0  ;;  %v774_v8 = vld [vmem:[%s1129_s9 + $0x191] sm:$0xff] }
  0x3c   : > { %v454_v19 = vadd.f32 %v446_v52, %v424_v4  ;;  %v369_v21 = vadd.f32 %v361_v58, %v339_v7  ;;  %874 = vmatmul.mubr.f32.vlgmr.msra.gmra.mxu1 %v509_v15  ;;  %v387_v27 = vmul.f32 %v1158_v20, %v770_v14  ;;  %v332_v5 = vmul.f32 %v1139_v9, %v756_v18  ;;  %v783_v9 = vld [vmem:[%s1129_s9 + $0x80] sm:$0xff]  ;;  %s215_s9 = sand.u32 1, %s1005_s19  }
  0x3d   : > { %v336_v26 = vadd.f32 %v328_v3, %v306_v16  ;;  %v281_v35 = vadd.f32 %v273_v23, %v243_v17  ;;  %v479_v36 = vmul.f32 %v1187_v32, %v800_v1  ;;  %v417_v6 = vmul.f32 %v1164_v22, %v1190_v33  ;;  %s736_s23 = sshll.u32 %s215_s9, 6  ;;  %s1380_s22 = scalar_lea.sflag [#allocation3], %s215_s9 }
  0x3e   : > { %v483_v30 = vadd.f32 %v475_v63, %v454_v19  ;;  %v398_v31 = vadd.f32 %v390_v12, %v369_v21  ;;  %v362_v43 = vmul.f32 %v1144_v10, %v765_v29  ;;  %v447_v45 = vmul.f32 %v1175_v28, %v1196_v37  ;;  %s1359_s25 = scalar_lea.vmem [#allocation2], %s736_s23 }
  0x3f   : > { %v366_v39 = vadd.f32 %v358_v11, %v336_v26  ;;  %v310_v42 = vadd.f32 %v302_v24, %v281_v35  ;;  %v391_v50 = vmul.f32 %v1158_v20, %v774_v8  ;;  %v476_v33 = vmul.f32 %v1187_v32, %v1199_v38  ;;  %s670_s30 = sshll.u32 %s1359_s25, 4  ;;  %s1374_s30 = int_to_ptr.vmem [resolvable:$true] %s670_s30 }
  0x40   : > { %v498_v40 = vadd.f32 %v1258_v34, %v483_v30  ;;  %v428_v41 = vadd.f32 %v420_v13, %v398_v31  ;;  %v421_v10 = vmul.f32 %v1164_v22, %v783_v9  ;;  %v451_v57 = vmul.f32 %v1175_v28, %v792_v49  ;;  %v804_v28 = vld [vmem:[%s1424_s4] ss:$0 sm:$0xff]  ;;  %s953_s10 = scalar_lea.vmem %s1374_s30, 1024  ;;  %p960_p0 = scmp.lt.s32.totalorder %s1374_s30, %s958_s12 }
  0x41   : > { %v395_v44 = vadd.f32 %v387_v27, %v366_v39  ;;  %v340_v48 = vadd.f32 %v332_v5, %v310_v42  ;;  %v480_v38 = vmul.f32 %v1187_v32, %v801_v55  ;;  %p954_p11 = scmp.ne.s32.totalorder %s1374_s30, %s953_s10  ;;  %p961_p1 = scmp.lt.s32.totalorder %s959_s13, %s953_s10 }
  0x42   : > { %v506_v46 = vmax.f32 %v498_v40, 0.0  ;;  %v458_v47 = vadd.f32 %v450_v25, %v428_v41 }
  0x43   : > { %v425_v51 = vadd.f32 %v417_v6, %v395_v44  ;;  %v370_v53 = vadd.f32 %v362_v43, %v340_v48  ;;  %p955_p12 = pnand %p954_p11, %p1086_p5  ;;  %p962_p2 = por %p961_p1, %p960_p0 }
  0x44   : > { %870 = vmatprep.mubr.f32.mxu0 %v506_v46  ;;  %v487_v52 = vadd.f32 %v479_v36, %v458_v47 }
  0x45   : > { %v455_v54 = vadd.f32 %v447_v45, %v425_v51  ;;  %v399_v56 = vadd.f32 %v391_v50, %v370_v53  ;;  %p956_p13 = pneg %p955_p12 }
  0x46   : > { %v502_v37 = vadd.f32 %v1258_v34, %v487_v52 }
  0x47   : > { %v484_v20 = vadd.f32 %v476_v33, %v455_v54  ;;  %v429_v59 = vadd.f32 %v421_v10, %v399_v56  ;;  %p963_p3 = pnand %p962_p2, %p956_p13 }
  0x48   : > { %v510_v58 = vmax.f32 %v502_v37, 0.0 }
  0x49   : > { %v499_v60 = vadd.f32 %v1258_v34, %v484_v20  ;;  %v459_v61 = vadd.f32 %v451_v57, %v429_v59 }
  0x4a   : > { %876 = vmatprep.mubr.f32.mxu1 %v510_v58 }
  0x4b   : > { %v507_v62 = vmax.f32 %v499_v60, 0.0  ;;  %v488_v22 = vadd.f32 %v480_v38, %v459_v61 }
  0x4d   : > { %871 = vmatmul.mubr.f32.gmra.mxu0 %v507_v62  ;;  %v503_v63 = vadd.f32 %v1258_v34, %v488_v22 }
  0x4f   : > { %v511_v0 = vmax.f32 %v503_v63, 0.0 }
  0x51   : > { %877 = vmatmul.mubr.f32.gmra.mxu1 %v511_v0 }
  0xf5   : > { %v869_v1 = vpop.f32.mrf.mxu0 }
  0xf6   : > { %v607_v32 = vadd.f32 %v869_v1, %v804_v28 }
  0xf7   : > { %v601_v2 = vpop.f32.mrf.mxu0 }
  0xf8   : > { %v641_v3 = vmax.f32 %v607_v32, 0.0  ;;  %v602_v4 = vadd.f32 %v804_v28, %v601_v2 }
  0xfa   : > { %649 = vst [vmem:[%s1359_s25 + $0x8] sm:$0xff] %v641_v3  ;;  %v640_v34 = vmax.f32 %v602_v4, 0.0 }
  0xfc   : > { %v875_v7 = vpop.f32.mrf.mxu1  ;;  %648 = vst [vmem:[%s1359_s25] sm:$0xff] %v640_v34 }
  0xfd   : > { %v627_v12 = vadd.f32 %v875_v7, %v804_v28 }
  0xfe   : > { %v621_v13 = vpop.f32.mrf.mxu1 }
  0xff   : > { %v645_v14 = vmax.f32 %v627_v12, 0.0  ;;  %v622_v15 = vadd.f32 %v804_v28, %v621_v13 }
 0x101   : > { %653 = vst [vmem:[%s1359_s25 + $0x28] sm:$0xff] %v645_v14  ;;  %v644_v16 = vmax.f32 %v622_v15, 0.0 }
 0x103   : > { %652 = vst [vmem:[%s1359_s25 + $0x20] sm:$0xff] %v644_v16 }
 0x10d   : > { %v872_v11 = vpop.f32.mrf.mxu0 }
 0x10e   : > { %v617_v17 = vadd.f32 %v872_v11, %v804_v28 }
 0x10f   : > { %v611_v18 = vpop.f32.mrf.mxu0 }
 0x110   : > { %v643_v19 = vmax.f32 %v617_v17, 0.0  ;;  %v612_v21 = vadd.f32 %v804_v28, %v611_v18 }
 0x111   : > { %v878_v23 = vpop.f32.mrf.mxu1 }
 0x112   : > { %651 = vst [vmem:[%s1359_s25 + $0x18] sm:$0xff] %v643_v19  ;;  %v642_v24 = vmax.f32 %v612_v21, 0.0  ;;  %v637_v25 = vadd.f32 %v878_v23, %v804_v28 }
 0x113   : > { %v631_v26 = vpop.f32.mrf.mxu1 }
 0x114   : > { %650 = vst [vmem:[%s1359_s25 + $0x10] sm:$0xff] %v642_v24  ;;  %v647_v27 = vmax.f32 %v637_v25, 0.0  ;;  %v632_v29 = vadd.f32 %v804_v28, %v631_v26 }
 0x116   : > { %655 = vst [vmem:[%s1359_s25 + $0x38] sm:$0xff] %v647_v27  ;;  %v646_v30 = vmax.f32 %v632_v29, 0.0 }
 0x118   : > { %654 = vst [vmem:[%s1359_s25 + $0x30] sm:$0xff] %v646_v30 }
 0x119   : > { %966 = shalt.err (!%p963_p3)
}
 0x11a   : > { %s967_s15 = scalar_lea.hbm %s1372_s8, 1024  ;;  %s971_s14 = scalar_lea.hbm %s1425_s5, 2048 }
 0x11b   : > { %p968_p4 = scmp.ne.s32.totalorder %s1372_s8, %s967_s15  ;;  %p972_p9 = scmp.lt.s32.totalorder %s1372_s8, %s1425_s5 }
 0x11c   : > { %p973_p10 = scmp.lt.s32.totalorder %s971_s14, %s967_s15 }
 0x11d   : > { %p969_p7 = pnand %p968_p4, %p1086_p5 }
 0x11e   : > { %p974_p11 = por %p973_p10, %p972_p9 }
 0x11f   : > { %p970_p8 = pneg %p969_p7 }
 0x121   : > { %p975_p12 = pnand %p974_p11, %p970_p8 }
 0x123   : > { %978 = shalt.err (!%p975_p12)
}
 0x124   : > { %s1016_s25 = smov 128   ;;  %s1017_s26 = smov 8  }
 0x125   : > { %912 = dma.vmem_to_hbm [thread:$0]  (%p1086_p5), %s1374_s30, 1024, %s1372_s8, %s1380_s22, %s1016_s25, %s1016_s25, %s1017_s26  }
 0x126 PF: > { %p918_p13 = scmp.ge.s32.totalorder %s1013_s21, 2  ;;  %s685_s6 = sand.u32 1, %s1001_s18  }
 0x127   : > { %s686_s7 = scalar_lea.sflag [#allocation3], %s685_s6 }
 0x128   : > { %p915_p0 = pnand %p918_p13, %p1090_p6 }
 0x12a   : > { %p916_p1 = pneg %p915_p0 }
 0x12c   : > { %996 = dma.done.wait (%p916_p1), %s686_s7, 1024  }
 0x12d   : > { %998 = vsyncadd (%p916_p1), %s686_s7, 4294966272  ;;  %p15_p2 = scmp.ge.s32.totalorder %s1073_s24, 4   ;;  %s1428_s18 = smov %s1005_s19 }
 0x12e   : > { %s1429_s19 = smov %s1009_s20  ;;  %s1430_s20 = smov %s1084_s27 }
 0x12f   : > { %s1431_s21 = smov %s1073_s24  ;;  %17 = sbr.rel (!%p15_p2) target bundleno = 3 (0x3), region = 80 }
 0x134   :  { %691 = vsyncpa [#allocation3], 1 }
 0x135   :  { %693 = vsyncpa [#allocation3 + $0x1], 1 }

</bundles_post_ra>
